<compile_context>
chip_gen: v5e
topology: v5e:2x2
jax: 0.10.0
libtpu: 0.0.40
codegen_flags: <defaults>
</compile_context>

<pallas_src>
import functools

import jax
import jax.numpy as jnp
from jax.experimental import pallas as pl
from jax.experimental.pallas import tpu as pltpu


# ----------------------------------------------------------------------------
# Fused residual-attention-block kernel (one batch element per grid step)
# ----------------------------------------------------------------------------
def _block_kernel(*args, n_head: int, has_mask: bool):
    if has_mask:
        x_ref, mask_ref, *rest = args
    else:
        x_ref, *rest = args
        mask_ref = None
    (ln1_w_ref, ln1_b_ref,
     w_in_ref, b_in_ref,          # in_proj (pre-transposed): (D, 3D), (1, 3D)
     w_out_ref, b_out_ref,        # out_proj(pre-transposed): (D, D),  (1, D)
     ln2_w_ref, ln2_b_ref,
     w_fc_ref, b_fc_ref,          # c_fc   (pre-transposed): (D, 4D), (1, 4D)
     w_pr_ref, b_pr_ref,          # c_proj (pre-transposed): (4D, D), (1, D)
     o_ref) = rest

    cdt = w_in_ref.dtype                     # matmul-input (compute) dtype
    approx_recip = cdt != jnp.float32        # exact 1/x on the pure-f32 path

    x = x_ref[0]                              # (L, D) f32 residual stream
    L, D = x.shape
    hd = D // n_head
    eps = 1e-5

    def layernorm(v, w, b):                   # f32 statistics
        mu = jnp.mean(v, axis=-1, keepdims=True)
        var = jnp.mean((v - mu) ** 2, axis=-1, keepdims=True)
        return (v - mu) * jax.lax.rsqrt(var + eps) * w + b

    # ---- attention branch ---------------------------------------------------
    ln1 = layernorm(x, ln1_w_ref[...], ln1_b_ref[...])
    qkv = jnp.dot(ln1.astype(cdt), w_in_ref[...],
                  preferred_element_type=jnp.float32) + b_in_ref[...]   # (L,3D)
    # NOTE: 1/sqrt(hd) is already folded into the q-rows of w_in / b_in.
    q3 = jnp.transpose(qkv[:, 0:D].astype(cdt).reshape(L, n_head, hd),
                       (1, 0, 2))                                       # (H,L,hd)
    k3 = jnp.transpose(qkv[:, D:2 * D].astype(cdt).reshape(L, n_head, hd),
                       (1, 0, 2))
    v3 = jnp.transpose(qkv[:, 2 * D:3 * D].astype(cdt).reshape(L, n_head, hd),
                       (1, 0, 2))

    # head-batched scores: one (H, L, L) tensor, no per-head Python unroll
    s = jnp.einsum('hld,hmd->hlm', q3, k3,
                   preferred_element_type=jnp.float32)                  # (H,L,L)
    if has_mask:
        s = s + mask_ref[...]                                           # bcast (L,L)
    s = s - jnp.max(s, axis=-1, keepdims=True)
    p = jnp.exp(s)
    p = p * pl.reciprocal(jnp.sum(p, axis=-1, keepdims=True),
                          approx=approx_recip)
    o3 = jnp.einsum('hlm,hmd->hld', p.astype(cdt), v3,
                    preferred_element_type=jnp.float32)                 # (H,L,hd)
    attn_in = jnp.transpose(o3.astype(cdt), (1, 0, 2)).reshape(L, D)    # (L, D)

    attn = jnp.dot(attn_in, w_out_ref[...],
                   preferred_element_type=jnp.float32) + b_out_ref[...]
    x = x + attn

    # ---- MLP branch (QuickGELU) ---------------------------------------------
    ln2 = layernorm(x, ln2_w_ref[...], ln2_b_ref[...])
    hden = jnp.dot(ln2.astype(cdt), w_fc_ref[...],
                   preferred_element_type=jnp.float32) + b_fc_ref[...]  # (L,4D)
    # QuickGELU: x * sigmoid(1.702 x); sigmoid in compute dtype (bf16 EUP on
    # v6e/v7x roughly doubles transcendental throughput).
    gate = jax.nn.sigmoid((1.702 * hden).astype(cdt)).astype(jnp.float32)
    hden = hden * gate
    mlp = jnp.dot(hden.astype(cdt), w_pr_ref[...],
                  preferred_element_type=jnp.float32) + b_pr_ref[...]
    o_ref[0] = x + mlp


# ----------------------------------------------------------------------------
# Wrapper-side helpers
# ----------------------------------------------------------------------------
def _vmem_limit_bytes():
    """Per-generation scoped-VMEM cap: ~85% of physical VMEM
    (~108 MiB on v5e/v6e, ~54 MiB on v7x)."""
    try:
        cap = int(pltpu.get_tpu_info().vmem_capacity_bytes)
    except Exception:                     # conservative fallback
        cap = 64 * 2 ** 20
    return max(16 * 2 ** 20, int(0.85 * cap))


def prepare_block_params(p, n_head, compute_dtype=jnp.bfloat16):
    """One-time weight preparation (call at model load, NOT per forward):
    pre-transpose linear weights so the kernel feeds the MXU the contraction
    directly, cast matmul weights to bf16/f32, and fold 1/sqrt(head_dim) into
    the q-rows of the in_proj weight/bias."""
    f32 = jnp.float32
    D = p["w_out"].shape[0]
    scale = 1.0 / ((D // n_head) ** 0.5)

    w_in = p["w_in"].astype(f32)                                  # (3D, D)
    w_in = jnp.concatenate([w_in[:D] * scale, w_in[D:]], axis=0)
    b_in = p["b_in"].astype(f32)                                  # (1, 3D)
    b_in = jnp.concatenate([b_in[:, :D] * scale, b_in[:, D:]], axis=1)

    return {
        "ln1_w": p["ln1_w"].astype(f32), "ln1_b": p["ln1_b"].astype(f32),
        "w_in": w_in.T.astype(compute_dtype),    # (D, 3D)
        "b_in": b_in,
        "w_out": p["w_out"].T.astype(compute_dtype),   # (D, D)
        "b_out": p["b_out"].astype(f32),
        "ln2_w": p["ln2_w"].astype(f32), "ln2_b": p["ln2_b"].astype(f32),
        "w_fc": p["w_fc"].T.astype(compute_dtype),     # (D, 4D)
        "b_fc": p["b_fc"].astype(f32),
        "w_pr": p["w_pr"].T.astype(compute_dtype),     # (4D, D)
        "b_pr": p["b_pr"].astype(f32),
    }


def prepare_transformer_params(layer_params, n_head,
                               compute_dtype=jnp.bfloat16):
    return [prepare_block_params(p, n_head, compute_dtype)
            for p in layer_params]


def residual_attention_block(x_bld, kp, n_head, mask=None):
    """x_bld: (B, L, D) f32.  kp: prepared (transposed/casted/folded) weights."""
    B, L, D = x_bld.shape
    weight_args = (kp["ln1_w"], kp["ln1_b"], kp["w_in"], kp["b_in"],
                   kp["w_out"], kp["b_out"], kp["ln2_w"], kp["ln2_b"],
                   kp["w_fc"], kp["b_fc"], kp["w_pr"], kp["b_pr"])
    has_mask = mask is not None

    in_specs = [pl.BlockSpec((1, L, D), lambda b: (b, 0, 0))]
    inputs = [x_bld]
    if has_mask:
        # constant index -> single-buffer (no benefit from pipelining)
        in_specs.append(pl.BlockSpec((L, L), lambda b: (0, 0),
                                     pipeline_mode=pl.Buffered(1)))
        inputs.append(mask.astype(jnp.float32))
    # weights/biases: constant index_map -> single-buffer to halve weight VMEM
    in_specs += [pl.BlockSpec(w.shape, lambda b: (0, 0),
                              pipeline_mode=pl.Buffered(1))
                 for w in weight_args]
    inputs += list(weight_args)

    return pl.pallas_call(
        functools.partial(_block_kernel, n_head=n_head, has_mask=has_mask),
        out_shape=jax.ShapeDtypeStruct((B, L, D), jnp.float32),
        grid=(B,),
        in_specs=in_specs,
        out_specs=pl.BlockSpec((1, L, D), lambda b: (b, 0, 0)),
        compiler_params=pltpu.CompilerParams(
            dimension_semantics=("parallel",),
            vmem_limit_bytes=_vmem_limit_bytes()),
    )(*inputs)


def transformer_forward(x_lnd, prepared_layer_params, n_head, attn_mask=None):
    """Matches Transformer.forward: x is (L, N, D), returns (L, N, D).
    `prepared_layer_params` must come from prepare_transformer_params()."""
    x = jnp.transpose(x_lnd, (1, 0, 2)).astype(jnp.float32)      # (B, L, D)
    mask = None if attn_mask is None else attn_mask.astype(jnp.float32)
    # TODO(synk): cross-layer weight prefetch (cross-pallas_call DMA future)
    # to hide each layer's weight reload behind the previous layer's compute.
    for kp in prepared_layer_params:
        x = residual_attention_block(x, kp, n_head, mask=mask)
    return jnp.transpose(x, (1, 0, 2))


# ----------------------------------------------------------------------------
# Pure-JAX reference (for correctness check)
# ----------------------------------------------------------------------------
def _ref_block(x, mask, p, n_head):
    def ln(v, w, b):
        mu = v.mean(-1, keepdims=True)
        var = ((v - mu) ** 2).mean(-1, keepdims=True)
        return (v - mu) / jnp.sqrt(var + 1e-5) * w + b

    B, L, D = x.shape
    hd = D // n_head
    l1 = ln(x, p["ln1_w"], p["ln1_b"])
    qkv = l1 @ p["w_in"].T + p["b_in"]
    q, k, v = qkv[..., :D], qkv[..., D:2 * D], qkv[..., 2 * D:]
    q = q.reshape(B, L, n_head, hd).transpose(0, 2, 1, 3)
    k = k.reshape(B, L, n_head, hd).transpose(0, 2, 1, 3)
    v = v.reshape(B, L, n_head, hd).transpose(0, 2, 1, 3)
    s = jnp.einsum("bhld,bhmd->bhlm", q, k) / (hd ** 0.5) + mask
    pr = jax.nn.softmax(s, axis=-1)
    o = jnp.einsum("bhlm,bhmd->bhld", pr, v).transpose(0, 2, 1, 3).reshape(B, L, D)
    x = x + (o @ p["w_out"].T + p["b_out"])
    l2 = ln(x, p["ln2_w"], p["ln2_b"])
    h = l2 @ p["w_fc"].T + p["b_fc"]
    h = h * jax.nn.sigmoid(1.702 * h)
    return x + (h @ p["w_pr"].T + p["b_pr"])


def _ref_transformer(x_lnd, layer_params, n_head, attn_mask=None):
    L = x_lnd.shape[0]
    x = jnp.transpose(x_lnd, (1, 0, 2))
    mask = jnp.zeros((L, L), jnp.float32) if attn_mask is None else attn_mask
    for p in layer_params:
        x = _ref_block(x, mask, p, n_head)
    return jnp.transpose(x, (1, 0, 2))


# ----------------------------------------------------------------------------
# Deterministic parameter init (shapes follow the PyTorch module __init__)
# ----------------------------------------------------------------------------
def init_params(key, width, layers):
    D = width
    params = []
    for _ in range(layers):
        key, *ks = jax.random.split(key, 7)
        params.append({
            "ln1_w": jnp.ones((1, D), jnp.float32),
            "ln1_b": jnp.zeros((1, D), jnp.float32),
            "w_in":  0.05 * jax.random.normal(ks[0], (3 * D, D), jnp.float32),
            "b_in":  0.01 * jax.random.normal(ks[1], (1, 3 * D), jnp.float32),
            "w_out": 0.05 * jax.random.normal(ks[2], (D, D), jnp.float32),
            "b_out": jnp.zeros((1, D), jnp.float32),
            "ln2_w": jnp.ones((1, D), jnp.float32),
            "ln2_b": jnp.zeros((1, D), jnp.float32),
            "w_fc":  0.05 * jax.random.normal(ks[3], (4 * D, D), jnp.float32),
            "b_fc":  0.01 * jax.random.normal(ks[4], (1, 4 * D), jnp.float32),
            "w_pr":  0.05 * jax.random.normal(ks[5], (D, 4 * D), jnp.float32),
            "b_pr":  jnp.zeros((1, D), jnp.float32),
        })
    return params


if __name__ == "__main__":
    # Small config: width=32, heads=4, layers=2, seq L=8, batch N=2
    # (the demo block shapes equal the full arrays; real configs keep D and L
    #  multiples of 128/8 so tiled BlockSpecs satisfy the (8,128) constraint)
    WIDTH, HEADS, LAYERS, SEQ, BATCH = 32, 4, 2, 8, 2

    key = jax.random.PRNGKey(0)
    kx, kp = jax.random.split(key)
    x = jax.random.normal(kx, (SEQ, BATCH, WIDTH), jnp.float32)   # (L, N, D)
    params = init_params(kp, WIDTH, LAYERS)

    # One-time weight preparation (hoisted out of the forward path).
    prep_f32 = prepare_transformer_params(params, HEADS, jnp.float32)
    prep_bf16 = prepare_transformer_params(params, HEADS, jnp.bfloat16)

    # 1) exact-semantics check (no mask): f32 path matches the reference tightly
    ref = _ref_transformer(x, params, HEADS)
    out_f32 = jax.block_until_ready(transformer_forward(x, prep_f32, HEADS))
    assert out_f32.shape == (SEQ, BATCH, WIDTH)
    assert bool(jnp.allclose(out_f32, ref, atol=1e-4, rtol=1e-4)), \
        "f32 path mismatch vs reference"

    # 2) attn_mask path (causal mask), f32 compute
    cmask = jnp.triu(jnp.full((SEQ, SEQ), -1e9, jnp.float32), k=1)
    ref_m = _ref_transformer(x, params, HEADS, attn_mask=cmask)
    out_m = jax.block_until_ready(
        transformer_forward(x, prep_f32, HEADS, attn_mask=cmask))
    assert bool(jnp.allclose(out_m, ref_m, atol=1e-4, rtol=1e-4)), \
        "masked f32 path mismatch vs reference"

    # 3) optimized path: bf16 matmul inputs/weights, f32 LN/softmax/accumulate
    out_bf16 = jax.block_until_ready(transformer_forward(x, prep_bf16, HEADS))
    assert out_bf16.shape == (SEQ, BATCH, WIDTH)
    assert bool(jnp.allclose(out_bf16, ref, atol=3e-2, rtol=3e-2)), \
        "bf16 path mismatch vs reference"

    print("KERNEL_OK")
</pallas_src>

<mosaic_0001>
module attributes {stable_mosaic.version = 11 : i64} {
  func.func @_block_kernel(%arg0: i32, %arg1: memref<1x8x32xf32, #tpu.memory_space<vmem>>, %arg2: memref<1x32xf32, #tpu.memory_space<vmem>>, %arg3: memref<1x32xf32, #tpu.memory_space<vmem>>, %arg4: memref<32x96xf32, #tpu.memory_space<vmem>>, %arg5: memref<1x96xf32, #tpu.memory_space<vmem>>, %arg6: memref<32x32xf32, #tpu.memory_space<vmem>>, %arg7: memref<1x32xf32, #tpu.memory_space<vmem>>, %arg8: memref<1x32xf32, #tpu.memory_space<vmem>>, %arg9: memref<1x32xf32, #tpu.memory_space<vmem>>, %arg10: memref<32x128xf32, #tpu.memory_space<vmem>>, %arg11: memref<1x128xf32, #tpu.memory_space<vmem>>, %arg12: memref<128x32xf32, #tpu.memory_space<vmem>>, %arg13: memref<1x32xf32, #tpu.memory_space<vmem>>, %arg14: memref<1x8x32xf32, #tpu.memory_space<vmem>>) attributes {dimension_semantics = [#tpu.dimension_semantics<parallel>], iteration_bounds = array<i64: 2>, scalar_prefetch = 0 : i64, scratch_operands = 0 : i64, tpu.core_type = #tpu.core_type<tc>, window_params = [{transform_indices = @transform_0, window_bounds = array<i64: 1, 8, 32>}, {pipeline_mode = #tpu.pipeline_mode<synchronous>, transform_indices = @transform_1, window_bounds = array<i64: 1, 32>}, {pipeline_mode = #tpu.pipeline_mode<synchronous>, transform_indices = @transform_2, window_bounds = array<i64: 1, 32>}, {pipeline_mode = #tpu.pipeline_mode<synchronous>, transform_indices = @transform_3, window_bounds = array<i64: 32, 96>}, {pipeline_mode = #tpu.pipeline_mode<synchronous>, transform_indices = @transform_4, window_bounds = array<i64: 1, 96>}, {pipeline_mode = #tpu.pipeline_mode<synchronous>, transform_indices = @transform_5, window_bounds = array<i64: 32, 32>}, {pipeline_mode = #tpu.pipeline_mode<synchronous>, transform_indices = @transform_6, window_bounds = array<i64: 1, 32>}, {pipeline_mode = #tpu.pipeline_mode<synchronous>, transform_indices = @transform_7, window_bounds = array<i64: 1, 32>}, {pipeline_mode = #tpu.pipeline_mode<synchronous>, transform_indices = @transform_8, window_bounds = array<i64: 1, 32>}, {pipeline_mode = #tpu.pipeline_mode<synchronous>, transform_indices = @transform_9, window_bounds = array<i64: 32, 128>}, {pipeline_mode = #tpu.pipeline_mode<synchronous>, transform_indices = @transform_10, window_bounds = array<i64: 1, 128>}, {pipeline_mode = #tpu.pipeline_mode<synchronous>, transform_indices = @transform_11, window_bounds = array<i64: 128, 32>}, {pipeline_mode = #tpu.pipeline_mode<synchronous>, transform_indices = @transform_12, window_bounds = array<i64: 1, 32>}, {transform_indices = @transform_13, window_bounds = array<i64: 1, 8, 32>}]} {
    %c0 = arith.constant 0 : index
    %c0_0 = arith.constant 0 : index
    %c0_1 = arith.constant 0 : index
    %0 = vector.load %arg1[%c0, %c0_0, %c0_1] : memref<1x8x32xf32, #tpu.memory_space<vmem>>, vector<1x8x32xf32>
    %1 = vector.shape_cast %0 : vector<1x8x32xf32> to vector<8x32xf32>
    %c0_2 = arith.constant 0 : index
    %c0_3 = arith.constant 0 : index
    %2 = vector.load %arg2[%c0_2, %c0_3] : memref<1x32xf32, #tpu.memory_space<vmem>>, vector<1x32xf32>
    %c0_4 = arith.constant 0 : index
    %c0_5 = arith.constant 0 : index
    %3 = vector.load %arg3[%c0_4, %c0_5] : memref<1x32xf32, #tpu.memory_space<vmem>>, vector<1x32xf32>
    %cst = arith.constant dense<0.000000e+00> : vector<8xf32>
    %4 = vector.multi_reduction <add>, %1, %cst [1] : vector<8x32xf32> to vector<8xf32>
    %5 = vector.shape_cast %4 : vector<8xf32> to vector<8x1xf32>
    %cst_6 = arith.constant 3.200000e+01 : f32
    %6 = vector.broadcast %cst_6 : f32 to vector<8x1xf32>
    %7 = arith.divf %5, %6 : vector<8x1xf32>
    %8 = vector.broadcast %7 : vector<8x1xf32> to vector<8x32xf32>
    %9 = arith.subf %1, %8 : vector<8x32xf32>
    %10 = arith.mulf %9, %9 : vector<8x32xf32>
    %cst_7 = arith.constant dense<0.000000e+00> : vector<8xf32>
    %11 = vector.multi_reduction <add>, %10, %cst_7 [1] : vector<8x32xf32> to vector<8xf32>
    %12 = vector.shape_cast %11 : vector<8xf32> to vector<8x1xf32>
    %cst_8 = arith.constant 3.200000e+01 : f32
    %13 = vector.broadcast %cst_8 : f32 to vector<8x1xf32>
    %14 = arith.divf %12, %13 : vector<8x1xf32>
    %15 = vector.broadcast %7 : vector<8x1xf32> to vector<8x32xf32>
    %16 = arith.subf %1, %15 : vector<8x32xf32>
    %cst_9 = arith.constant 9.99999974E-6 : f32
    %17 = vector.broadcast %cst_9 : f32 to vector<8x1xf32>
    %18 = arith.addf %14, %17 : vector<8x1xf32>
    %19 = math.rsqrt %18 : vector<8x1xf32>
    %20 = vector.broadcast %19 : vector<8x1xf32> to vector<8x32xf32>
    %21 = arith.mulf %16, %20 : vector<8x32xf32>
    %22 = vector.broadcast %2 : vector<1x32xf32> to vector<8x32xf32>
    %23 = arith.mulf %21, %22 : vector<8x32xf32>
    %24 = vector.broadcast %3 : vector<1x32xf32> to vector<8x32xf32>
    %25 = arith.addf %23, %24 : vector<8x32xf32>
    %c0_10 = arith.constant 0 : index
    %c0_11 = arith.constant 0 : index
    %26 = vector.load %arg4[%c0_10, %c0_11] : memref<32x96xf32, #tpu.memory_space<vmem>>, vector<32x96xf32>
    %cst_12 = arith.constant dense<0.000000e+00> : vector<8x96xf32>
    %27 = tpu.matmul %25, %26, %cst_12 {dimension_numbers = #tpu.dot_dimension_numbers<[1], [0], [0], [1], [0, 0, 1, 1], [], []>} : vector<8x32xf32>, vector<32x96xf32>, vector<8x96xf32> -> vector<8x96xf32>
    %c0_13 = arith.constant 0 : index
    %c0_14 = arith.constant 0 : index
    %28 = vector.load %arg5[%c0_13, %c0_14] : memref<1x96xf32, #tpu.memory_space<vmem>>, vector<1x96xf32>
    %29 = vector.broadcast %28 : vector<1x96xf32> to vector<8x96xf32>
    %30 = arith.addf %27, %29 : vector<8x96xf32>
    %31 = vector.extract_strided_slice %30 {offsets = [0, 0], sizes = [8, 32], strides = [1, 1]} : vector<8x96xf32> to vector<8x32xf32>
    %32 = vector.shape_cast %31 : vector<8x32xf32> to vector<8x4x8xf32>
    %33 = tpu.transpose %32, [1, 0, 2] : vector<8x4x8xf32> -> vector<4x8x8xf32>
    %34 = vector.extract_strided_slice %30 {offsets = [0, 32], sizes = [8, 32], strides = [1, 1]} : vector<8x96xf32> to vector<8x32xf32>
    %35 = vector.shape_cast %34 : vector<8x32xf32> to vector<8x4x8xf32>
    %36 = tpu.transpose %35, [1, 0, 2] : vector<8x4x8xf32> -> vector<4x8x8xf32>
    %37 = vector.extract_strided_slice %30 {offsets = [0, 64], sizes = [8, 32], strides = [1, 1]} : vector<8x96xf32> to vector<8x32xf32>
    %38 = vector.shape_cast %37 : vector<8x32xf32> to vector<8x4x8xf32>
    %39 = tpu.transpose %38, [1, 0, 2] : vector<8x4x8xf32> -> vector<4x8x8xf32>
    "tpu.trace_start"() <{level = 10 : i32, message = "hld,hmd->hlm"}> : () -> ()
    %cst_15 = arith.constant dense<0.000000e+00> : vector<4x8x8xf32>
    %40 = tpu.matmul %33, %36, %cst_15 {dimension_numbers = #tpu.dot_dimension_numbers<[2], [2], [1], [1], [0, 0, 0, 1, 1, 1], [0], [0]>} : vector<4x8x8xf32>, vector<4x8x8xf32>, vector<4x8x8xf32> -> vector<4x8x8xf32>
    "tpu.trace_stop"() : () -> ()
    %cst_16 = arith.constant dense<0xFF800000> : vector<4x8xf32>
    %41 = vector.multi_reduction <maximumf>, %40, %cst_16 [2] : vector<4x8x8xf32> to vector<4x8xf32>
    %42 = vector.shape_cast %41 : vector<4x8xf32> to vector<4x8x1xf32>
    %43 = vector.broadcast %42 : vector<4x8x1xf32> to vector<4x8x8xf32>
    %44 = arith.subf %40, %43 : vector<4x8x8xf32>
    %45 = math.exp %44 : vector<4x8x8xf32>
    %cst_17 = arith.constant dense<0.000000e+00> : vector<4x8xf32>
    %46 = vector.multi_reduction <add>, %45, %cst_17 [2] : vector<4x8x8xf32> to vector<4x8xf32>
    %47 = vector.shape_cast %46 : vector<4x8xf32> to vector<4x8x1xf32>
    %48 = tpu.reciprocal %47 : vector<4x8x1xf32> -> vector<4x8x1xf32>
    %49 = vector.broadcast %48 : vector<4x8x1xf32> to vector<4x8x8xf32>
    %50 = arith.mulf %45, %49 : vector<4x8x8xf32>
    "tpu.trace_start"() <{level = 10 : i32, message = "hlm,hmd->hld"}> : () -> ()
    %cst_18 = arith.constant dense<0.000000e+00> : vector<4x8x8xf32>
    %51 = tpu.matmul %50, %39, %cst_18 {dimension_numbers = #tpu.dot_dimension_numbers<[2], [1], [1], [2], [0, 0, 0, 1, 1, 2], [0], [0]>} : vector<4x8x8xf32>, vector<4x8x8xf32>, vector<4x8x8xf32> -> vector<4x8x8xf32>
    "tpu.trace_stop"() : () -> ()
    %52 = tpu.transpose %51, [1, 0, 2] : vector<4x8x8xf32> -> vector<8x4x8xf32>
    %53 = vector.shape_cast %52 : vector<8x4x8xf32> to vector<8x32xf32>
    %c0_19 = arith.constant 0 : index
    %c0_20 = arith.constant 0 : index
    %54 = vector.load %arg6[%c0_19, %c0_20] : memref<32x32xf32, #tpu.memory_space<vmem>>, vector<32x32xf32>
    %cst_21 = arith.constant dense<0.000000e+00> : vector<8x32xf32>
    %55 = tpu.matmul %53, %54, %cst_21 {dimension_numbers = #tpu.dot_dimension_numbers<[1], [0], [0], [1], [0, 0, 1, 1], [], []>} : vector<8x32xf32>, vector<32x32xf32>, vector<8x32xf32> -> vector<8x32xf32>
    %c0_22 = arith.constant 0 : index
    %c0_23 = arith.constant 0 : index
    %56 = vector.load %arg7[%c0_22, %c0_23] : memref<1x32xf32, #tpu.memory_space<vmem>>, vector<1x32xf32>
    %57 = vector.broadcast %56 : vector<1x32xf32> to vector<8x32xf32>
    %58 = arith.addf %55, %57 : vector<8x32xf32>
    %59 = arith.addf %1, %58 : vector<8x32xf32>
    %c0_24 = arith.constant 0 : index
    %c0_25 = arith.constant 0 : index
    %60 = vector.load %arg8[%c0_24, %c0_25] : memref<1x32xf32, #tpu.memory_space<vmem>>, vector<1x32xf32>
    %c0_26 = arith.constant 0 : index
    %c0_27 = arith.constant 0 : index
    %61 = vector.load %arg9[%c0_26, %c0_27] : memref<1x32xf32, #tpu.memory_space<vmem>>, vector<1x32xf32>
    %cst_28 = arith.constant dense<0.000000e+00> : vector<8xf32>
    %62 = vector.multi_reduction <add>, %59, %cst_28 [1] : vector<8x32xf32> to vector<8xf32>
    %63 = vector.shape_cast %62 : vector<8xf32> to vector<8x1xf32>
    %cst_29 = arith.constant 3.200000e+01 : f32
    %64 = vector.broadcast %cst_29 : f32 to vector<8x1xf32>
    %65 = arith.divf %63, %64 : vector<8x1xf32>
    %66 = vector.broadcast %65 : vector<8x1xf32> to vector<8x32xf32>
    %67 = arith.subf %59, %66 : vector<8x32xf32>
    %68 = arith.mulf %67, %67 : vector<8x32xf32>
    %cst_30 = arith.constant dense<0.000000e+00> : vector<8xf32>
    %69 = vector.multi_reduction <add>, %68, %cst_30 [1] : vector<8x32xf32> to vector<8xf32>
    %70 = vector.shape_cast %69 : vector<8xf32> to vector<8x1xf32>
    %cst_31 = arith.constant 3.200000e+01 : f32
    %71 = vector.broadcast %cst_31 : f32 to vector<8x1xf32>
    %72 = arith.divf %70, %71 : vector<8x1xf32>
    %73 = vector.broadcast %65 : vector<8x1xf32> to vector<8x32xf32>
    %74 = arith.subf %59, %73 : vector<8x32xf32>
    %cst_32 = arith.constant 9.99999974E-6 : f32
    %75 = vector.broadcast %cst_32 : f32 to vector<8x1xf32>
    %76 = arith.addf %72, %75 : vector<8x1xf32>
    %77 = math.rsqrt %76 : vector<8x1xf32>
    %78 = vector.broadcast %77 : vector<8x1xf32> to vector<8x32xf32>
    %79 = arith.mulf %74, %78 : vector<8x32xf32>
    %80 = vector.broadcast %60 : vector<1x32xf32> to vector<8x32xf32>
    %81 = arith.mulf %79, %80 : vector<8x32xf32>
    %82 = vector.broadcast %61 : vector<1x32xf32> to vector<8x32xf32>
    %83 = arith.addf %81, %82 : vector<8x32xf32>
    %c0_33 = arith.constant 0 : index
    %c0_34 = arith.constant 0 : index
    %84 = vector.load %arg10[%c0_33, %c0_34] : memref<32x128xf32, #tpu.memory_space<vmem>>, vector<32x128xf32>
    %cst_35 = arith.constant dense<0.000000e+00> : vector<8x128xf32>
    %85 = tpu.matmul %83, %84, %cst_35 {dimension_numbers = #tpu.dot_dimension_numbers<[1], [0], [0], [1], [0, 0, 1, 1], [], []>} : vector<8x32xf32>, vector<32x128xf32>, vector<8x128xf32> -> vector<8x128xf32>
    %c0_36 = arith.constant 0 : index
    %c0_37 = arith.constant 0 : index
    %86 = vector.load %arg11[%c0_36, %c0_37] : memref<1x128xf32, #tpu.memory_space<vmem>>, vector<1x128xf32>
    %87 = vector.broadcast %86 : vector<1x128xf32> to vector<8x128xf32>
    %88 = arith.addf %85, %87 : vector<8x128xf32>
    %cst_38 = arith.constant 1.702000e+00 : f32
    %89 = vector.broadcast %cst_38 : f32 to vector<8x128xf32>
    %90 = arith.mulf %89, %88 : vector<8x128xf32>
    %91 = arith.negf %90 : vector<8x128xf32>
    %92 = math.exp %91 : vector<8x128xf32>
    %cst_39 = arith.constant 1.000000e+00 : f32
    %93 = vector.broadcast %cst_39 : f32 to vector<8x128xf32>
    %94 = arith.addf %93, %92 : vector<8x128xf32>
    %95 = arith.divf %93, %94 : vector<8x128xf32>
    %96 = arith.mulf %88, %95 : vector<8x128xf32>
    %c0_40 = arith.constant 0 : index
    %c0_41 = arith.constant 0 : index
    %97 = vector.load %arg12[%c0_40, %c0_41] : memref<128x32xf32, #tpu.memory_space<vmem>>, vector<128x32xf32>
    %cst_42 = arith.constant dense<0.000000e+00> : vector<8x32xf32>
    %98 = tpu.matmul %96, %97, %cst_42 {dimension_numbers = #tpu.dot_dimension_numbers<[1], [0], [0], [1], [0, 0, 1, 1], [], []>} : vector<8x128xf32>, vector<128x32xf32>, vector<8x32xf32> -> vector<8x32xf32>
    %c0_43 = arith.constant 0 : index
    %c0_44 = arith.constant 0 : index
    %99 = vector.load %arg13[%c0_43, %c0_44] : memref<1x32xf32, #tpu.memory_space<vmem>>, vector<1x32xf32>
    %100 = vector.broadcast %99 : vector<1x32xf32> to vector<8x32xf32>
    %101 = arith.addf %98, %100 : vector<8x32xf32>
    %102 = arith.addf %59, %101 : vector<8x32xf32>
    %c0_45 = arith.constant 0 : index
    %c0_46 = arith.constant 0 : index
    %c0_47 = arith.constant 0 : index
    %103 = vector.load %arg14[%c0_45, %c0_46, %c0_47] : memref<1x8x32xf32, #tpu.memory_space<vmem>>, vector<1x8x32xf32>
    %104 = vector.shape_cast %103 : vector<1x8x32xf32> to vector<8x32xf32>
    %105 = vector.shape_cast %102 : vector<8x32xf32> to vector<1x8x32xf32>
    tpu.vector_store %arg14[%c0_45, %c0_46, %c0_47], %105 {strides = array<i32>} : memref<1x8x32xf32, #tpu.memory_space<vmem>>, vector<1x8x32xf32>,
    return
  }
  func.func @transform_0(%arg0: i32) -> (i32, i32, i32) {
    %c0_i32 = arith.constant 0 : i32
    %c0_i32_0 = arith.constant 0 : i32
    %c0_i32_1 = arith.constant 0 : i32
    return %arg0, %c0_i32, %c0_i32_0 : i32, i32, i32
  }
  func.func @transform_1(%arg0: i32) -> (i32, i32) {
    %c0_i32 = arith.constant 0 : i32
    %c0_i32_0 = arith.constant 0 : i32
    %c0_i32_1 = arith.constant 0 : i32
    return %c0_i32, %c0_i32_0 : i32, i32
  }
  func.func @transform_2(%arg0: i32) -> (i32, i32) {
    %c0_i32 = arith.constant 0 : i32
    %c0_i32_0 = arith.constant 0 : i32
    %c0_i32_1 = arith.constant 0 : i32
    return %c0_i32, %c0_i32_0 : i32, i32
  }
  func.func @transform_3(%arg0: i32) -> (i32, i32) {
    %c0_i32 = arith.constant 0 : i32
    %c0_i32_0 = arith.constant 0 : i32
    %c0_i32_1 = arith.constant 0 : i32
    return %c0_i32, %c0_i32_0 : i32, i32
  }
  func.func @transform_4(%arg0: i32) -> (i32, i32) {
    %c0_i32 = arith.constant 0 : i32
    %c0_i32_0 = arith.constant 0 : i32
    %c0_i32_1 = arith.constant 0 : i32
    return %c0_i32, %c0_i32_0 : i32, i32
  }
  func.func @transform_5(%arg0: i32) -> (i32, i32) {
    %c0_i32 = arith.constant 0 : i32
    %c0_i32_0 = arith.constant 0 : i32
    %c0_i32_1 = arith.constant 0 : i32
    return %c0_i32, %c0_i32_0 : i32, i32
  }
  func.func @transform_6(%arg0: i32) -> (i32, i32) {
    %c0_i32 = arith.constant 0 : i32
    %c0_i32_0 = arith.constant 0 : i32
    %c0_i32_1 = arith.constant 0 : i32
    return %c0_i32, %c0_i32_0 : i32, i32
  }
  func.func @transform_7(%arg0: i32) -> (i32, i32) {
    %c0_i32 = arith.constant 0 : i32
    %c0_i32_0 = arith.constant 0 : i32
    %c0_i32_1 = arith.constant 0 : i32
    return %c0_i32, %c0_i32_0 : i32, i32
  }
  func.func @transform_8(%arg0: i32) -> (i32, i32) {
    %c0_i32 = arith.constant 0 : i32
    %c0_i32_0 = arith.constant 0 : i32
    %c0_i32_1 = arith.constant 0 : i32
    return %c0_i32, %c0_i32_0 : i32, i32
  }
  func.func @transform_9(%arg0: i32) -> (i32, i32) {
    %c0_i32 = arith.constant 0 : i32
    %c0_i32_0 = arith.constant 0 : i32
    %c0_i32_1 = arith.constant 0 : i32
    return %c0_i32, %c0_i32_0 : i32, i32
  }
  func.func @transform_10(%arg0: i32) -> (i32, i32) {
    %c0_i32 = arith.constant 0 : i32
    %c0_i32_0 = arith.constant 0 : i32
    %c0_i32_1 = arith.constant 0 : i32
    return %c0_i32, %c0_i32_0 : i32, i32
  }
  func.func @transform_11(%arg0: i32) -> (i32, i32) {
    %c0_i32 = arith.constant 0 : i32
    %c0_i32_0 = arith.constant 0 : i32
    %c0_i32_1 = arith.constant 0 : i32
    return %c0_i32, %c0_i32_0 : i32, i32
  }
  func.func @transform_12(%arg0: i32) -> (i32, i32) {
    %c0_i32 = arith.constant 0 : i32
    %c0_i32_0 = arith.constant 0 : i32
    %c0_i32_1 = arith.constant 0 : i32
    return %c0_i32, %c0_i32_0 : i32, i32
  }
  func.func @transform_13(%arg0: i32) -> (i32, i32, i32) {
    %c0_i32 = arith.constant 0 : i32
    %c0_i32_0 = arith.constant 0 : i32
    %c0_i32_1 = arith.constant 0 : i32
    return %arg0, %c0_i32, %c0_i32_0 : i32, i32, i32
  }
}

</mosaic_0001>

<bundles_post_ra>
// kernel: tpu_custom_call.1
= control target key start
LH: loop header
LB: loop body
LE: loop exit
PB: predicated region body
PF: predicated region fallthrough
CT: control target
= control target key end

     0   :  { %s2248_s0 = inlined_call_operand.vmem [shape: f32[2,8,32], index: 0, kind: input, shape index: {}]   ;;  %s2249_s1 = inlined_call_operand.vmem [shape: f32[1,32], index: 1, kind: input, shape index: {}]   ;;  %s2250_s2 = inlined_call_operand.vmem [shape: f32[1,32], index: 2, kind: input, shape index: {}]   ;;  %s2251_s3 = inlined_call_operand.vmem [shape: f32[32,96], index: 3, kind: input, shape index: {}]   ;;  %s2252_s4 = inlined_call_operand.vmem [shape: f32[1,96], index: 4, kind: input, shape index: {}]   ;;  %s2253_s5 = inlined_call_operand.vmem [shape: f32[32,32], index: 5, kind: input, shape index: {}]   ;;  %s2254_s6 = inlined_call_operand.vmem [shape: f32[1,32], index: 6, kind: input, shape index: {}]   ;;  %s2255_s7 = inlined_call_operand.vmem [shape: f32[1,32], index: 7, kind: input, shape index: {}]   ;;  %s2256_s8 = inlined_call_operand.vmem [shape: f32[1,32], index: 8, kind: input, shape index: {}]   ;;  %s2257_s9 = inlined_call_operand.vmem [shape: f32[32,128], index: 9, kind: input, shape index: {}]   ;;  %s2258_s10 = inlined_call_operand.vmem [shape: f32[1,128], index: 10, kind: input, shape index: {}]   ;;  %s2259_s11 = inlined_call_operand.vmem [shape: f32[128,32], index: 11, kind: input, shape index: {}]   ;;  %s2260_s12 = inlined_call_operand.vmem [shape: f32[1,32], index: 12, kind: input, shape index: {}]   ;;  %s2261_s13 = inlined_call_operand.hbm [shape: f32[2,8,32], index: 13, kind: output, shape index: {}]  }
   0x1   :  { %2262 = sst [smem:[#allocation5_spill]] %s2248_s0 }
   0x2   :  { %2263 = sst [smem:[#allocation6_spill]] %s2249_s1 }
   0x3   :  { %2264 = sst [smem:[#allocation7_spill]] %s2250_s2 }
   0x4   :  { %2265 = sst [smem:[#allocation8_spill]] %s2251_s3 }
   0x5   :  { %18 = vsyncpa [#allocation3], 0 }
   0x6   :  { %20 = vsyncpa [#allocation3 + $0x1], 0  ;;  %s1791_s25 = smov 0   ;;  %s1793_s26 = smov 0  }
   0x7   :  { %s1795_s27 = smov 0   ;;  %s1797_s28 = smov 0  }
   0x8 LB: > { %s1812_s29 = sadd.s32 4294967295, %s1708_s28   ;;  %s1526_s30 = sadd.s32 4294967294, %s1708_s28   ;;  %s1708_s28 = sphi %s1797_s28, %s2275_s28   ;;  %s1704_s27 = sphi %s1795_s27, %s2274_s27   ;;  %s1700_s26 = sphi %s1793_s26, %s2273_s26   ;;  %s1696_s25 = sphi %s1791_s25, %s2272_s25  }
   0x9   : > { %s1816_s14 = sadd.s32 1, %s1708_s28   ;;  %s311_s15 = sadd.s32 1, %s1704_s27 }
   0xa   : > { %s308_s16 = ssub.s32 %s1708_s28, %s1816_s14  ;;  %p321_p0 = scmp.ne.s32.totalorder %s1704_s27, %s1700_s26 }
   0xb   : > { %p309_p1 = scmp.eq.s32.totalorder %s308_s16, 0  ;;  %p322_p2 = scmp.eq.s32.totalorder %s1812_s29, 1 }
   0xc   : > { %p327_p3 = scmp.ne.s32.totalorder %s1700_s26, %s1696_s25  ;;  %p328_p4 = scmp.eq.s32.totalorder %s1526_s30, 1 }
   0xd   : > { %s1827_s17 = scalar_select %p309_p1, %s1704_s27, %s311_s15  }
   0xe   : > { %p1829_p5 = por %p322_p2, %p321_p0  ;;  %p1833_p6 = por %p328_p4, %p327_p3 }
   0xf   : > { %p1529_p7 = scmp.ge.s32.totalorder %s1708_s28, 1  ;;  %p389_p8 = scmp.lt.s32.totalorder %s1708_s28, 3 }
  0x11   : > { %p390_p9 = pnand %p1529_p7, %p389_p8 }
  0x12   : > { %p432_p10 = scmp.lt.s32.totalorder (!%p390_p9), %s1812_s29, 1  ;;  %s2268_s0 = sld [smem:[#allocation5_spill]] (!%p390_p9) }
  0x13   : > { %393 = sbr.rel (%p390_p9) target bundleno = 2063 (0x80f), region = 72  ;;  %s2269_s3 = sld [smem:[#allocation8_spill]] (!%p390_p9) }
  0x14   : > { %s2270_s1 = sld [smem:[#allocation6_spill]] (!%p390_p9)  ;;  %s1711_s23 = smov (!%p390_p9), 104  }
  0x15   : > { %s2271_s2 = sld [smem:[#allocation7_spill]] (!%p390_p9)  ;;  %s1713_s30 = smov (!%p390_p9), 96  }
  0x16   : > { %s1714_s15 = smov (!%p390_p9), 112   ;;  %s1717_s16 = smov (!%p390_p9), 64  }
  0x17   : > { %s1720_s22 = smov (!%p390_p9), 24  }
  0x18   : > { %s433_s20 = scalar_select %p432_p10, %s1812_s29, 1  ;;  %vm439_vm0 = vcmask 261120   ;;  %v1710_v2 = vmov 32.0   ;;  %v1614_v33 = vld [vmem:[%s2252_s4] ss:$0 sm:$0xff]  ;;  %vm519_vm5 = vcmask 1047556  }
  0x19   : > { %1620 = vrcp.f32 %v1710_v2  ;;  %v480_v14 = vld [vmem:[%s2269_s3 + $0x18] sm:$0xff]  ;;  %v479_v15 = vld [vmem:[%s2269_s3 + $0x10] sm:$0xff]  ;;  %v478_v16 = vld [vmem:[%s2269_s3 + $0x8] sm:$0xff]  ;;  %v1715_v38 = vmov 1983009808   ;;  %vm873_vm6 = vcmask 64512  }
  0x1a   : > { %s1531_s21 = sshll.u32 %s433_s20, 3  ;;  %500 = vmatpush.msra.mxu1 %v480_v14  ;;  %v477_v17 = vld [vmem:[%s2269_s3] sm:$0xff]  ;;  %v524_v39 = vunpack.c.l.s4 %v1715_v38  ;;  %v1716_v45 = vmov 1934713408   ;;  %s1718_s20 = smov 16  }
  0x1b   : > { %s435_s24 = scalar_lea.vmem %s2268_s0, %s1531_s21  ;;  %v1612_v27 = vld [vmem:[%s2270_s1] ss:$0 sm:$0xff]  ;;  %v548_v46 = vunpack.c.l.s4 %v1716_v45  ;;  %s1719_s21 = smov 8  }
  0x1c   : > { %v1844_v0 = vld [vmem:[%s435_s24] sm:$0xff]  ;;  %501 = vmatpush.msra.mxu1 %v479_v15  ;;  %s1712_s24 = smov 120   ;;  %v1894_v44 = vunpack.c.0.s8 %v524_v39  ;;  %s1549_s0 = sshll.u32 %s1812_s29, 3 }
  0x1d   : > { %v440_v1 = vsel %vm439_vm0, %v1844_v0, 0.0  ;;  %v1613_v30 = vld [vmem:[%s2271_s2] ss:$0 sm:$0xff]  ;;  %v1901_v51 = vunpack.c.0.s8 %v548_v46 }
  0x1e   : > { %441 = vadd.xlane.f32.xlu0 %v440_v1  ;;  %502 = vmatpush.msra.mxu1 %v478_v16 }
  0x1f   : > { %v1621_v3 = vpop.eup %1620 }
  0x20   : > { %v444_v4 = vmul.f32 32.0, %v1621_v3  ;;  %vm448_vm1 = vweird.f32 %v1621_v3  ;;  %503 = vmatpush.msra.mxu1 %v477_v17 }
  0x22   : > { %v445_v5 = vsub.f32 1.0, %v444_v4 }
  0x24   : > { %v446_v6 = vmul.f32 %v1621_v3, %v445_v5 }
  0x26   : > { %v447_v7 = vadd.f32 %v1621_v3, %v446_v6 }
  0x28   : > { %v1848_v8 = vsel %vm448_vm1, %v1621_v3, %v447_v7 }
  0x91   : > { %v442_v9 = vpop.xlane.xlu0 %441 }
  0x92   : > { %v450_v10 = vmul.f32 %v1848_v8, %v442_v9 }
  0x94   : > { %v451_v11 = vsub.f32 %v1844_v0, %v450_v10 }
  0x96   : > { %v452_v12 = vmul.f32 %v451_v11, %v451_v11 }
  0x98   : > { %v453_v13 = vsel %vm439_vm0, %v452_v12, 0.0 }
  0x99   : > { %454 = vadd.xlane.f32.xlu0 %v453_v13 }
 0x10c   : > { %v455_v18 = vpop.xlane.xlu0 %454 }
 0x10d   : > { %v456_v19 = vmul.f32 %v455_v18, %v1848_v8 }
 0x10f   : > { %v457_v20 = vadd.f32 1e-05, %v456_v19 }
 0x111   : > { %1622 = vrsqrt.f32 %v457_v20  ;;  %vm464_vm3 = vweird.f32 %v457_v20 }
 0x117   : > { %v1623_v21 = vpop.eup %1622 }
 0x118   : > { %v459_v22 = vmul.f32 %v1623_v21, %v457_v20  ;;  %vm465_vm2 = vweird.f32 %v1623_v21 }
 0x119   : > { %vm466_vm4 = vmor %vm464_vm3, %vm465_vm2 }
 0x11a   : > { %v460_v23 = vmul.f32 %v1623_v21, %v459_v22 }
 0x11c   : > { %v461_v24 = vmul.f32 0.5, %v460_v23 }
 0x11e   : > { %v462_v25 = vsub.f32 1.5, %v461_v24 }
 0x120   : > { %v463_v26 = vmul.f32 %v1623_v21, %v462_v25 }
 0x122   : > { %v467_v28 = vsel %vm466_vm4, %v1623_v21, %v463_v26 }
 0x123   : > { %v468_v29 = vmul.f32 %v467_v28, %v451_v11 }
 0x125   : > { %v472_v31 = vmul.f32 %v1612_v27, %v468_v29 }
 0x127   : > { %v476_v32 = vadd.f32 %v1613_v30, %v472_v31 }
 0x129   : > { %1532 = vmatmul.msk.f32.vlgmr.msra.gmra.mxu1 %vm439_vm0, %v476_v32 }
 0x1a6   : > { %v505_v34 = vpop.f32.mrf.mxu1 }
 0x1a7   : > { %v1876_v35 = vadd.f32 %v1614_v33, %v505_v34 }
 0x1a9   : > { %515 = vrot.lane.b32.xlu2 %v1876_v35, %s1711_s23  ;;  %509 = vrot.lane.b32.xlu1 %v1876_v35, %s1712_s24  ;;  %v521_v48 = vrot.slane %v1876_v35, 4 }
 0x1b1   : > { %629 = vrot.lane.b32.xlu2 %v1876_v35, %s1713_s30  ;;  %512 = vrot.lane.b32.xlu1 %v1876_v35, %s1714_s15 }
 0x203   : > { %v1882_v36 = vpop.permute.xlu2 %515 }
 0x204   : > { %635 = vrot.lane.b32.xlu2 %v1882_v36, %s1713_s30  ;;  %v531_v37 = vrot.slane %v1882_v36, 4 }
 0x21b   : > { %v1886_v40 = vpop.permute.xlu1 %509 }
 0x21c   : > { %v532_v41 = vsel %vm519_vm5, %v531_v37, %v1886_v40  ;;  %v533_v42 = vrot.slane %v1886_v40, 4  ;;  %631 = vrot.lane.b32.xlu0 %v1886_v40, %s1713_s30 }
 0x21d   : > { %v538_v49 = vperm.slane %v532_v41, %v1894_v44 }
 0x21e   : > { %v534_v43 = vsel %vm519_vm5, %v1882_v36, %v533_v42 }
 0x21f   : > { %v542_v47 = vperm.slane %v534_v43, %v1894_v44  ;;  %v543_v57 = vrot.slane %v538_v49, 4 }
 0x221   : > { %v555_v54 = vrot.slane %v542_v47, 4 }
 0x223   : > { %v1899_v50 = vpop.permute.xlu1 %512 }
 0x224   : > { %v518_v52 = vrot.slane %v1899_v50, 4  ;;  %v522_v53 = vsel %vm519_vm5, %v1899_v50, %v521_v48  ;;  %633 = vrot.lane.b32.xlu1 %v1899_v50, %s1713_s30 }
 0x225   : > { %v530_v55 = vperm.slane %v522_v53, %v1894_v44 }
 0x226   : > { %v520_v56 = vsel %vm519_vm5, %v518_v52, %v1876_v35 }
 0x227   : > { %v526_v58 = vperm.slane %v520_v56, %v1894_v44  ;;  %v556_v59 = vsel %vm519_vm5, %v555_v54, %v530_v55  ;;  %v557_v60 = vrot.slane %v530_v55, 4 }
 0x228   : > { %v562_v61 = vperm.slane %v556_v59, %v1901_v51 }
 0x229   : > { %v544_v62 = vsel %vm519_vm5, %v543_v57, %v526_v58  ;;  %v545_v63 = vrot.slane %v526_v58, 4  ;;  %v558_v1 = vsel %vm519_vm5, %v542_v47, %v557_v60 }
 0x22a   : > { %v550_v2 = vperm.slane %v544_v62, %v1901_v51  ;;  %v566_v3 = vperm.slane %v558_v1, %v1901_v51  ;;  %v571_v6 = vrot.slane %v562_v61, 4 }
 0x22b   : > { %v546_v4 = vsel %vm519_vm5, %v538_v49, %v545_v63  ;;  %v630_v49 = vpop.permute.xlu2 %629 }
 0x22c   : > { %v554_v5 = vperm.slane %v546_v4, %v1901_v51  ;;  %v573_v7 = vrot.slane %v566_v3, 4  ;;  %v567_v10 = vrot.slane %v550_v2, 4  ;;  %v572_v15 = vsel %vm519_vm5, 0.0, %v571_v6 }
 0x22d   : > { %v643_v59 = vrot.slane %v630_v49, 4 }
 0x22e   : > { %v574_v9 = vsel %vm519_vm5, 0.0, %v573_v7  ;;  %v569_v11 = vrot.slane %v554_v5, 4  ;;  %v586_v12 = vsel %vm519_vm5, %v573_v7, %v562_v61  ;;  %v568_v22 = vsel %vm519_vm5, 0.0, %v567_v10 }
 0x22f   : > { %v591_v13 = vrot.slane %v574_v9, 4  ;;  %v590_v14 = vperm.slane %v586_v12, %v1894_v44 }
 0x230   : > { %v570_v16 = vsel %vm519_vm5, 0.0, %v569_v11  ;;  %v575_v17 = vsel %vm519_vm5, %v569_v11, %v550_v2 }
 0x231   : > { %v579_v18 = vperm.slane %v575_v17, %v1894_v44  ;;  %v580_v19 = vrot.slane %v570_v16, 4  ;;  %v592_v20 = vsel %vm519_vm5, %v591_v13, %v572_v15  ;;  %v611_v21 = vrot.slane %v590_v14, 4 }
 0x232   : > { %v596_v23 = vperm.slane %v592_v20, %v1894_v44 }
 0x233   : > { %v581_v24 = vsel %vm519_vm5, %v580_v19, %v568_v22  ;;  %v599_v25 = vrot.slane %v579_v18, 4 }
 0x234   : > { %v585_v26 = vperm.slane %v581_v24, %v1894_v44  ;;  %v612_v27 = vsel %vm519_vm5, %v596_v23, %v611_v21  ;;  %v609_v28 = vrot.slane %v596_v23, 4 }
 0x235   : > { %v620_v29 = vperm.slane %v612_v27, %v1901_v51 }
 0x236   : > { %v600_v30 = vsel %vm519_vm5, %v585_v26, %v599_v25  ;;  %v597_v31 = vrot.slane %v585_v26, 4  ;;  %v610_v32 = vsel %vm519_vm5, %v609_v28, %v590_v14 }
 0x237   : > { %v608_v33 = vperm.slane %v600_v30, %v1901_v51  ;;  %v625_v34 = vrot.slane %v620_v29, 4  ;;  %v616_v37 = vperm.slane %v610_v32, %v1901_v51 }
 0x238   : > { %v598_v38 = vsel %vm519_vm5, %v597_v31, %v579_v18 }
 0x239   : > { %v1939_v39 = vsel %vm519_vm5, %v625_v34, %v608_v33  ;;  %v627_v41 = vrot.slane %v608_v33, 4  ;;  %v604_v42 = vperm.slane %v598_v38, %v1901_v51  ;;  %v621_v43 = vrot.slane %v616_v37, 4 }
 0x23b   : > { %v1943_v45 = vsel %vm519_vm5, %v621_v43, %v604_v42  ;;  %v623_v46 = vrot.slane %v604_v42, 4  ;;  %v1946_v47 = vsel %vm519_vm5, %v620_v29, %v627_v41 }
 0x23d   : > { %v1949_v48 = vsel %vm519_vm5, %v616_v37, %v623_v46 }
 0x25e   : > { %v636_v52 = vpop.permute.xlu2 %635 }
 0x25f   : > { %v653_v55 = vrot.slane %v636_v52, 4 }
 0x28e   : > { %v632_v53 = vpop.permute.xlu0 %631 }
 0x28f   : > { %v655_v54 = vrot.slane %v632_v53, 4  ;;  %v654_v57 = vsel %vm519_vm5, %v653_v55, %v632_v53 }
 0x290   : > { %v660_v60 = vperm.slane %v654_v57, %v1894_v44 }
 0x291   : > { %v656_v56 = vsel %vm519_vm5, %v636_v52, %v655_v54 }
 0x292   : > { %v664_v58 = vperm.slane %v656_v56, %v1894_v44  ;;  %v665_v4 = vrot.slane %v660_v60, 4 }
 0x294   : > { %v677_v1 = vrot.slane %v664_v58, 4 }
 0x296   : > { %v634_v61 = vpop.permute.xlu1 %633 }
 0x297   : > { %v641_v62 = vrot.slane %v634_v61, 4  ;;  %v644_v63 = vsel %vm519_vm5, %v634_v61, %v643_v59 }
 0x298   : > { %v652_v2 = vperm.slane %v644_v63, %v1894_v44 }
 0x299   : > { %v642_v3 = vsel %vm519_vm5, %v641_v62, %v630_v49 }
 0x29a   : > { %v648_v5 = vperm.slane %v642_v3, %v1894_v44  ;;  %v678_v6 = vsel %vm519_vm5, %v677_v1, %v652_v2  ;;  %v679_v7 = vrot.slane %v652_v2, 4 }
 0x29b   : > { %v684_v9 = vperm.slane %v678_v6, %v1901_v51 }
 0x29c   : > { %v666_v10 = vsel %vm519_vm5, %v665_v4, %v648_v5  ;;  %v667_v11 = vrot.slane %v648_v5, 4  ;;  %v680_v12 = vsel %vm519_vm5, %v664_v58, %v679_v7 }
 0x29d   : > { %v672_v13 = vperm.slane %v666_v10, %v1901_v51  ;;  %v688_v14 = vperm.slane %v680_v12, %v1901_v51  ;;  %v693_v17 = vrot.slane %v684_v9, 4 }
 0x29e   : > { %v668_v15 = vsel %vm519_vm5, %v660_v60, %v667_v11 }
 0x29f   : > { %v676_v16 = vperm.slane %v668_v15, %v1901_v51  ;;  %v695_v18 = vrot.slane %v688_v14, 4  ;;  %v689_v19 = vrot.slane %v672_v13, 4  ;;  %v694_v25 = vsel %vm519_vm5, 0.0, %v693_v17 }
 0x2a1   : > { %v691_v20 = vrot.slane %v676_v16, 4  ;;  %v696_v21 = vsel %vm519_vm5, 0.0, %v695_v18  ;;  %v708_v22 = vsel %vm519_vm5, %v695_v18, %v684_v9  ;;  %v690_v32 = vsel %vm519_vm5, 0.0, %v689_v19 }
 0x2a2   : > { %v712_v23 = vperm.slane %v708_v22, %v1894_v44  ;;  %v713_v24 = vrot.slane %v696_v21, 4 }
 0x2a3   : > { %v692_v26 = vsel %vm519_vm5, 0.0, %v691_v20  ;;  %v697_v27 = vsel %vm519_vm5, %v691_v20, %v672_v13 }
 0x2a4   : > { %v701_v28 = vperm.slane %v697_v27, %v1894_v44  ;;  %v702_v29 = vrot.slane %v692_v26, 4  ;;  %v714_v30 = vsel %vm519_vm5, %v713_v24, %v694_v25  ;;  %v733_v31 = vrot.slane %v712_v23, 4 }
 0x2a5   : > { %v718_v33 = vperm.slane %v714_v30, %v1894_v44 }
 0x2a6   : > { %v703_v34 = vsel %vm519_vm5, %v702_v29, %v690_v32  ;;  %v721_v37 = vrot.slane %v701_v28, 4 }
 0x2a7   : > { %v707_v38 = vperm.slane %v703_v34, %v1894_v44  ;;  %v734_v41 = vsel %vm519_vm5, %v718_v33, %v733_v31  ;;  %v731_v42 = vrot.slane %v718_v33, 4 }
 0x2a8   : > { %v742_v43 = vperm.slane %v734_v41, %v1901_v51 }
 0x2a9   : > { %v722_v46 = vsel %vm519_vm5, %v707_v38, %v721_v37  ;;  %v719_v49 = vrot.slane %v707_v38, 4  ;;  %v732_v52 = vsel %vm519_vm5, %v731_v42, %v712_v23 }
 0x2aa   : > { %v730_v53 = vperm.slane %v722_v46, %v1901_v51  ;;  %v747_v54 = vrot.slane %v742_v43, 4  ;;  %v738_v55 = vperm.slane %v732_v52, %v1901_v51 }
 0x2ab   : > { %v720_v56 = vsel %vm519_vm5, %v719_v49, %v701_v28 }
 0x2ac   : > { %v748_v57 = vsel %vm519_vm5, %v747_v54, %v730_v53  ;;  %v749_v58 = vrot.slane %v730_v53, 4  ;;  %v726_v59 = vperm.slane %v720_v56, %v1901_v51  ;;  %v743_v60 = vrot.slane %v738_v55, 4 }
 0x2ad   : > { %1537 = vmatpush.xpose.msk.msra.mxu3 %vm873_vm6, %v748_v57 }
 0x2ae   : > { %v744_v61 = vsel %vm519_vm5, %v743_v60, %v726_v59  ;;  %v750_v62 = vsel %vm519_vm5, %v742_v43, %v749_v58  ;;  %v745_v63 = vrot.slane %v726_v59, 4 }
 0x2af   : > { %1533 = vmatpush.xpose.msk.msrb.mxu1 %vm873_vm6, %v744_v61 }
 0x2b0   : > { %1538 = vmatmul.msk.f32.vlgmr.msra.gmra.mxu3 %vm873_vm6, %v1939_v39  ;;  %v746_v1 = vsel %vm519_vm5, %v738_v55, %v745_v63 }
 0x2b1   : > { %1535 = vmatpush.xpose.msk.msra.mxu2 %vm873_vm6, %v746_v1 }
 0x2b2   : > { %1534 = vmatmul.msk.f32.vlgmr.msrb.gmra.mxu1 %vm873_vm6, %v1943_v45 }
 0x2b3   : > { %1539 = vmatpush.xpose.msk.msra.mxu1 %vm873_vm6, %v750_v62 }
 0x2b4   : > { %1536 = vmatmul.msk.f32.vlgmr.msra.gmra.mxu2 %vm873_vm6, %v1949_v48  ;;  %v1602_v48 = vpack.i.bf16 %v1886_v40, %v1876_v35 }
 0x2ba   : > { %1540 = vmatmul.msk.f32.vlgmr.msra.gmra.mxu1 %vm873_vm6, %v1946_v47  ;;  %v1607_v47 = vpack.i.bf16 %v1882_v36, %v1899_v50 }
 0x32f   : > { %v897_v2 = vpop.f32.mrf.mxu1 }
 0x330   : > { %v978_v3 = vsel %vm873_vm6, %v897_v2, -inf }
 0x331   : > { %979 = vmax.xlane.f32.xlu1 %v978_v3 }
 0x333   : > { %v949_v39 = vpop.f32.mrf.mxu3 }
 0x334   : > { %v984_v4 = vsel %vm873_vm6, %v949_v39, -inf }
 0x335   : > { %985 = vmax.xlane.f32.xlu2 %v984_v4 }
 0x337   : > { %v923_v5 = vpop.f32.mrf.mxu2  ;;  %v975_v7 = vpop.f32.mrf.mxu1 }
 0x338   : > { %v981_v6 = vsel %vm873_vm6, %v923_v5, -inf  ;;  %v987_v45 = vsel %vm873_vm6, %v975_v7, -inf }
 0x339   : > { %982 = vmax.xlane.f32.xlu0 %v981_v6 }
 0x33d   : > { %988 = vmax.xlane.f32.xlu2 %v987_v45 }
 0x34a   : > { %1603 = vrot.lane.b32.xlu1 %v1602_v48, %s1717_s16 }
 0x355   : > { %1608 = vrot.lane.b32.xlu2 %v1607_v47, %s1717_s16  ;;  %s1462_s16 = scalar_lea.hbm %s2261_s13, %s1549_s0 }
 0x356   : > { %s1466_s2 = sshll.u32 %s1462_s16, 4  ;;  %s1467_s2 = int_to_ptr.hbm [resolvable:$true] %s1466_s2 }
 0x357   : > { %s1660_s3 = sshra.s32 %s1467_s2, 4  ;;  %s1661_s3 = int_to_ptr.hbm [resolvable:$true] %s1660_s3 }
 0x358   : > { %s1662_s24 = scalar_lea.hbm %s1661_s3, 8  ;;  %p1667_p0 = scmp.lt.s32.totalorder %s1661_s3, %s2261_s13 }
 0x359   : > { %p1663_p11 = scmp.ne.s32.totalorder %s1661_s3, %s1662_s24 }
 0x35b   : > { %p1664_p12 = pnand %p1663_p11, %p1829_p5 }
 0x35d   : > { %p1665_p13 = pneg %p1664_p12 }
 0x3a4   : > { %v980_v9 = vpop.xlane.xlu1 %979 }
 0x3a5   : > { %v990_v10 = vsub.f32 %v897_v2, %v980_v9 }
 0x3a7   : > { %v994_v11 = vmul.f32 1.442695, %v990_v10 }
 0x3a8   : > { %v986_v12 = vpop.xlane.xlu2 %985 }
 0x3a9   : > { %1624 = vpow2.f32 %v994_v11  ;;  %v992_v13 = vsub.f32 %v949_v39, %v986_v12 }
 0x3ab   : > { %v998_v14 = vmul.f32 1.442695, %v992_v13 }
 0x3ac   : > { %v983_v15 = vpop.xlane.xlu0 %982 }
 0x3ad   : > { %v991_v16 = vsub.f32 %v923_v5, %v983_v15  ;;  %1626 = vpow2.f32 %v998_v14 }
 0x3af   : > { %v2011_v17 = vpop.eup %1624  ;;  %v996_v18 = vmul.f32 1.442695, %v991_v16 }
 0x3b0   : > { %v989_v35 = vpop.xlane.xlu2 %988  ;;  %v1002_v40 = vsel %vm873_vm6, %v2011_v17, 0.0 }
 0x3b1   : > { %1628 = vpow2.f32 %v996_v18  ;;  %v993_v36 = vsub.f32 %v975_v7, %v989_v35  ;;  %1003 = vadd.xlane.f32.xlu0 %v1002_v40 }
 0x3b3   : > { %v1000_v50 = vmul.f32 1.442695, %v993_v36  ;;  %v2015_v19 = vpop.eup %1626 }
 0x3b4   : > { %v1008_v23 = vsel %vm873_vm6, %v2015_v19, 0.0 }
 0x3b5   : > { %1630 = vpow2.f32 %v1000_v50 }
 0x3b7   : > { %v2017_v20 = vpop.eup %1628 }
 0x3b8   : > { %v1609_v21 = vpop.permute.xlu2 %1608  ;;  %v1005_v22 = vsel %vm873_vm6, %v2017_v20, 0.0 }
 0x3b9   : > { %v1611_v24 = vunpack.i.h.bf16 %v1609_v21  ;;  %v1610_v25 = vunpack.i.l.bf16 %v1609_v21  ;;  %1006 = vadd.xlane.f32.xlu1 %v1005_v22  ;;  %1009 = vadd.xlane.f32.xlu0 %v1008_v23 }
 0x3bb   : > { %v2023_v27 = vpop.eup %1630  ;;  %v775_v28 = vrot.slane %v1611_v24, 4  ;;  %v763_v29 = vrot.slane %v1610_v25, 4 }
 0x3bc   : > { %v1604_v26 = vpop.permute.xlu1 %1603  ;;  %v1011_v42 = vsel %vm873_vm6, %v2023_v27, 0.0 }
 0x3bd   : > { %v1606_v30 = vunpack.i.h.bf16 %v1604_v26  ;;  %v1605_v31 = vunpack.i.l.bf16 %v1604_v26 }
 0x3bf   : > { %v777_v32 = vrot.slane %v1606_v30, 4  ;;  %v764_v33 = vsel %vm519_vm5, %v763_v29, %v1605_v31  ;;  %v765_v34 = vrot.slane %v1605_v31, 4  ;;  %v776_v37 = vsel %vm519_vm5, %v775_v28, %v1606_v30 }
 0x3c0   : > { %v770_v38 = vperm.slane %v764_v33, %v1894_v44  ;;  %v782_v41 = vperm.slane %v776_v37, %v1894_v44 }
 0x3c1   : > { %v766_v43 = vsel %vm519_vm5, %v1610_v25, %v765_v34  ;;  %v778_v46 = vsel %vm519_vm5, %v1611_v24, %v777_v32  ;;  %1012 = vadd.xlane.f32.xlu0 %v1011_v42 }
 0x3c2   : > { %v774_v49 = vperm.slane %v766_v43, %v1894_v44  ;;  %v786_v52 = vperm.slane %v778_v46, %v1894_v44  ;;  %v787_v53 = vrot.slane %v782_v41, 4  ;;  %v789_v54 = vrot.slane %v770_v38, 4 }
 0x3c4   : > { %v788_v55 = vsel %vm519_vm5, %v787_v53, %v770_v38  ;;  %v790_v56 = vsel %vm519_vm5, %v782_v41, %v789_v54  ;;  %v799_v57 = vrot.slane %v786_v52, 4  ;;  %v801_v58 = vrot.slane %v774_v49, 4 }
 0x3c5   : > { %v794_v59 = vperm.slane %v788_v55, %v1901_v51  ;;  %v798_v60 = vperm.slane %v790_v56, %v1901_v51 }
 0x3c6   : > { %v800_v61 = vsel %vm519_vm5, %v799_v57, %v774_v49  ;;  %v802_v62 = vsel %vm519_vm5, %v786_v52, %v801_v58 }
 0x3c7   : > { %v806_v63 = vperm.slane %v800_v61, %v1901_v51  ;;  %v810_v1 = vperm.slane %v802_v62, %v1901_v51  ;;  %v811_v2 = vrot.slane %v794_v59, 4  ;;  %v813_v3 = vrot.slane %v798_v60, 4 }
 0x3c9   : > { %v814_v39 = vsel %vm519_vm5, 0.0, %v813_v3  ;;  %v815_v4 = vrot.slane %v806_v63, 4  ;;  %v817_v5 = vrot.slane %v810_v1, 4  ;;  %v819_v6 = vsel %vm519_vm5, %v813_v3, %v794_v59 }
 0x3ca   : > { %v824_v7 = vrot.slane %v814_v39, 4  ;;  %v812_v45 = vsel %vm519_vm5, 0.0, %v811_v2  ;;  %v823_v47 = vperm.slane %v819_v6, %v1894_v44 }
 0x3cb   : > { %v818_v48 = vsel %vm519_vm5, 0.0, %v817_v5  ;;  %v830_v9 = vsel %vm519_vm5, %v817_v5, %v806_v63  ;;  %v816_v13 = vsel %vm519_vm5, 0.0, %v815_v4 }
 0x3cc   : > { %v835_v10 = vrot.slane %v818_v48, 4  ;;  %v825_v11 = vsel %vm519_vm5, %v824_v7, %v812_v45  ;;  %v834_v12 = vperm.slane %v830_v9, %v1894_v44  ;;  %v843_v15 = vrot.slane %v823_v47, 4 }
 0x3cd   : > { %v829_v14 = vperm.slane %v825_v11, %v1894_v44 }
 0x3ce   : > { %v836_v16 = vsel %vm519_vm5, %v835_v10, %v816_v13  ;;  %v855_v18 = vrot.slane %v834_v12, 4 }
 0x3cf   : > { %v840_v35 = vperm.slane %v836_v16, %v1894_v44  ;;  %v844_v40 = vsel %vm519_vm5, %v829_v14, %v843_v15  ;;  %v841_v36 = vrot.slane %v829_v14, 4 }
 0x3d0   : > { %v852_v50 = vperm.slane %v844_v40, %v1901_v51 }
 0x3d1   : > { %v856_v21 = vsel %vm519_vm5, %v840_v35, %v855_v18  ;;  %v842_v22 = vsel %vm519_vm5, %v841_v36, %v823_v47  ;;  %v853_v23 = vrot.slane %v840_v35, 4 }
 0x3d2   : > { %v864_v24 = vperm.slane %v856_v21, %v1901_v51  ;;  %v871_v25 = vrot.slane %v852_v50, 4  ;;  %v848_v26 = vperm.slane %v842_v22, %v1901_v51 }
 0x3d3   : > { %v854_v28 = vsel %vm519_vm5, %v853_v23, %v834_v12 }
 0x3d4   : > { %v872_v29 = vsel %vm519_vm5, %v864_v24, %v871_v25  ;;  %v860_v30 = vperm.slane %v854_v28, %v1901_v51  ;;  %v867_v31 = vrot.slane %v848_v26, 4  ;;  %v869_v32 = vrot.slane %v864_v24, 4 }
 0x3d5   : > { %1161 = vmatpush.msrb.mxu1 %v872_v29 }
 0x3d6   : > { %v868_v33 = vsel %vm519_vm5, %v860_v30, %v867_v31  ;;  %v865_v34 = vrot.slane %v860_v30, 4  ;;  %v870_v38 = vsel %vm519_vm5, %v869_v32, %v852_v50 }
 0x3d7   : > { %1115 = vmatpush.msrb.mxu3 %v868_v33 }
 0x3d8   : > { %v866_v37 = vsel %vm519_vm5, %v865_v34, %v848_v26 }
 0x3d9   : > { %1092 = vmatpush.msrb.mxu2 %v866_v37 }
 0x3db   : > { %1138 = vmatpush.msra.mxu2 %v870_v38 }
 0x424   : > { %v1004_v41 = vpop.xlane.xlu0 %1003 }
 0x425   : > { %1632 = vrcp.f32 %v1004_v41  ;;  %v1025_v54 = vand.u32 2147483648, %v1004_v41  ;;  %v1023_v55 = vand.u32 2147483647, %v1004_v41  ;;  %vm1019_vm8 = vweird.f32 %v1004_v41 }
 0x427   : > { %v1026_v59 = vor.u32 1.1754944e-38, %v1025_v54  ;;  %vm1024_vm10 = vcmp.eq.f32.partialorder %v1023_v55, 8.507059e+37 }
 0x42b   : > { %v1633_v42 = vpop.eup %1632 }
 0x42c   : > { %v1015_v43 = vmul.f32 %v1633_v42, %v1004_v41  ;;  %v1010_v46 = vpop.xlane.xlu0 %1009  ;;  %v1007_v49 = vpop.xlane.xlu1 %1006  ;;  %vm1020_vm7 = vweird.f32 %v1633_v42 }
 0x42d   : > { %1634 = vrcp.f32 %v1010_v46  ;;  %vm1021_vm9 = vmor %vm1019_vm8, %vm1020_vm7  ;;  %v1053_v3 = vand.u32 2147483648, %v1010_v46  ;;  %v1051_v6 = vand.u32 2147483647, %v1010_v46  ;;  %v1039_v7 = vand.u32 2147483648, %v1007_v49 }
 0x42e   : > { %v1016_v52 = vsub.f32 1.0, %v1015_v43  ;;  %1636 = vrcp.f32 %v1007_v49  ;;  %v1037_v48 = vand.u32 2147483647, %v1007_v49  ;;  %vm1047_vm13 = vweird.f32 %v1010_v46 }
 0x42f   : > { %v1054_v10 = vor.u32 1.1754944e-38, %v1053_v3  ;;  %vm1033_vm15 = vweird.f32 %v1007_v49  ;;  %vm1052_vm1 = vcmp.eq.f32.partialorder %v1051_v6, 8.507059e+37 }
 0x430   : > { %v1017_v53 = vmul.f32 %v1633_v42, %v1016_v52  ;;  %vm1038_vm3 = vcmp.eq.f32.partialorder %v1037_v48, 8.507059e+37 }
 0x432   : > { %v1018_v56 = vadd.f32 %v1633_v42, %v1017_v53 }
 0x433   : > { %v1635_v57 = vpop.eup %1634 }
 0x434   : > { %v1637_v58 = vpop.eup %1636  ;;  %v1043_v60 = vmul.f32 %v1635_v57, %v1010_v46  ;;  %v1013_v61 = vpop.xlane.xlu0 %1012  ;;  %v1022_v62 = vsel %vm1021_vm9, %v1633_v42, %v1018_v56  ;;  %vm1048_vm11 = vweird.f32 %v1635_v57 }
 0x435   : > { %v1029_v63 = vmul.f32 %v1637_v58, %v1007_v49  ;;  %1638 = vrcp.f32 %v1013_v61  ;;  %v1027_v2 = vsel %vm1024_vm10, %v1026_v59, %v1022_v62  ;;  %vm1034_vm12 = vweird.f32 %v1637_v58  ;;  %vm1049_vm14 = vmor %vm1047_vm13, %vm1048_vm11 }
 0x436   : > { %v1044_v1 = vsub.f32 1.0, %v1043_v60  ;;  %v1070_v4 = vmul.f32 %v2011_v17, %v1027_v2  ;;  %vm1035_vm2 = vmor %vm1033_vm15, %vm1034_vm12  ;;  %v1040_v17 = vor.u32 1.1754944e-38, %v1039_v7  ;;  %v1067_v40 = vand.u32 2147483648, %v1013_v61 }
 0x437   : > { %v1030_v39 = vsub.f32 1.0, %v1029_v63  ;;  %v1065_v21 = vand.u32 2147483647, %v1013_v61  ;;  %vm1061_vm7 = vweird.f32 %v1013_v61  ;;  %vm1291_vm10 = vcmask 195584  }
 0x438   : > { %v1045_v5 = vmul.f32 %v1635_v57, %v1044_v1  ;;  %1541 = vmatmul.msk.f32.vlgmr.msrb.gmra.mxu2 %vm873_vm6, %v1070_v4  ;;  %v1068_v23 = vor.u32 1.1754944e-38, %v1067_v40 }
 0x439   : > { %v1031_v45 = vmul.f32 %v1637_v58, %v1030_v39  ;;  %vm1066_vm9 = vcmp.eq.f32.partialorder %v1065_v21, 8.507059e+37 }
 0x43a   : > { %v1046_v47 = vadd.f32 %v1635_v57, %v1045_v5 }
 0x43b   : > { %v1639_v9 = vpop.eup %1638  ;;  %v1032_v11 = vadd.f32 %v1637_v58, %v1031_v45 }
 0x43c   : > { %v1050_v12 = vsel %vm1049_vm14, %v1635_v57, %v1046_v47  ;;  %v1057_v13 = vmul.f32 %v1639_v9, %v1013_v61  ;;  %vm1062_vm4 = vweird.f32 %v1639_v9 }
 0x43d   : > { %v1055_v14 = vsel %vm1052_vm1, %v1054_v10, %v1050_v12  ;;  %v1036_v15 = vsel %vm1035_vm2, %v1637_v58, %v1032_v11  ;;  %vm1063_vm8 = vmor %vm1061_vm7, %vm1062_vm4 }
 0x43e   : > { %v1058_v16 = vsub.f32 1.0, %v1057_v13  ;;  %v1041_v18 = vsel %vm1038_vm3, %v1040_v17, %v1036_v15  ;;  %v1072_v35 = vmul.f32 %v2015_v19, %v1055_v14 }
 0x43f   : > { %v1071_v36 = vmul.f32 %v2017_v20, %v1041_v18 }
 0x440   : > { %v1059_v50 = vmul.f32 %v1639_v9, %v1058_v16  ;;  %1543 = vmatmul.msk.f32.vlgmr.msra.gmra.mxu2 %vm873_vm6, %v1072_v35 }
 0x441   : > { %1542 = vmatmul.msk.f32.vlgmr.msrb.gmra.mxu3 %vm873_vm6, %v1071_v36 }
 0x442   : > { %v1060_v22 = vadd.f32 %v1639_v9, %v1059_v50 }
 0x444   : > { %v1064_v24 = vsel %vm1063_vm8, %v1639_v9, %v1060_v22 }
 0x445   : > { %v1069_v25 = vsel %vm1066_vm9, %v1068_v23, %v1064_v24 }
 0x446   : > { %v1073_v26 = vmul.f32 %v2023_v27, %v1069_v25 }
 0x448   : > { %1544 = vmatmul.msk.f32.vlgmr.msrb.gmra.mxu1 %vm873_vm6, %v1073_v26 }
 0x4bb   : > { %v1094_v19 = vpop.f32.mrf.mxu2 }
 0x4bc   : > { %v1168_v20 = vrot.slane %v1094_v19, 4 }
 0x4c3   : > { %v1140_v29 = vpop.f32.mrf.mxu2 }
 0x4c4   : > { %v1117_v28 = vpop.f32.mrf.mxu3  ;;  %v1166_v31 = vrot.slane %v1140_v29, 4  ;;  %v1169_v32 = vsel %vm519_vm5, %v1140_v29, %v1168_v20 }
 0x4c5   : > { %v1180_v30 = vrot.slane %v1117_v28, 4  ;;  %v1163_v33 = vpop.f32.mrf.mxu1  ;;  %v1177_v34 = vperm.slane %v1169_v32, %v1894_v44  ;;  %v1294_v32 = vld [vmem:[%s2253_s5 + $0x8] sm:$0xff] }
 0x4c6   : > { %v1178_v37 = vrot.slane %v1163_v33, 4  ;;  %v1167_v38 = vsel %vm519_vm5, %v1166_v31, %v1094_v19  ;;  %v1296_v31 = vld [vmem:[%s2253_s5 + $0x18] sm:$0xff] }
 0x4c7   : > { %v1181_v41 = vsel %vm519_vm5, %v1163_v33, %v1180_v30  ;;  %v1173_v27 = vperm.slane %v1167_v38, %v1894_v44  ;;  %v1204_v42 = vrot.slane %v1177_v34, 4  ;;  %1316 = vmatpush.msrb.mxu2 %v1296_v31  ;;  %v1293_v33 = vld [vmem:[%s2253_s5] sm:$0xff] }
 0x4c8   : > { %v1179_v43 = vsel %vm519_vm5, %v1178_v37, %v1117_v28  ;;  %v1189_v46 = vperm.slane %v1181_v41, %v1894_v44 }
 0x4c9   : > { %v1185_v49 = vperm.slane %v1179_v43, %v1894_v44  ;;  %v1192_v52 = vrot.slane %v1173_v27, 4  ;;  %v1615_v43 = vld [vmem:[%s2254_s6] ss:$0 sm:$0xff] }
 0x4ca   : > { %v1202_v53 = vrot.slane %v1189_v46, 4  ;;  %v1205_v54 = vsel %vm519_vm5, %v1189_v46, %v1204_v42 }
 0x4cb   : > { %v1190_v55 = vrot.slane %v1185_v49, 4  ;;  %v1213_v56 = vperm.slane %v1205_v54, %v1901_v51  ;;  %v1193_v57 = vsel %vm519_vm5, %v1185_v49, %v1192_v52 }
 0x4cc   : > { %v1203_v58 = vsel %vm519_vm5, %v1202_v53, %v1177_v34  ;;  %v1201_v60 = vperm.slane %v1193_v57, %v1901_v51 }
 0x4cd   : > { %v1191_v59 = vsel %vm519_vm5, %v1190_v55, %v1173_v27  ;;  %v1209_v61 = vperm.slane %v1203_v58, %v1901_v51  ;;  %v1220_v62 = vrot.slane %v1213_v56, 4 }
 0x4ce   : > { %v1197_v63 = vperm.slane %v1191_v59, %v1901_v51  ;;  %v1216_v1 = vrot.slane %v1201_v60, 4  ;;  %v1360_v59 = vld [vmem:[%s2257_s9 + $0x18] sm:$0xff]  ;;  %v1358_v60 = vld [vmem:[%s2257_s9 + $0x8] sm:$0xff] }
 0x4cf   : > { %v1218_v2 = vrot.slane %v1209_v61, 4  ;;  %v1221_v3 = vsel %vm519_vm5, 0.0, %v1220_v62  ;;  %v1233_v39 = vsel %vm519_vm5, %v1220_v62, %v1209_v61  ;;  %1380 = vmatpush.msra.mxu3 %v1360_v59  ;;  %v1357_v61 = vld [vmem:[%s2257_s9] sm:$0xff] }
 0x4d0   : > { %v1214_v4 = vrot.slane %v1197_v63, 4  ;;  %v1237_v5 = vperm.slane %v1233_v39, %v1894_v44  ;;  %v1238_v6 = vrot.slane %v1221_v3, 4  ;;  %v1217_v7 = vsel %vm519_vm5, 0.0, %v1216_v1 }
 0x4d1   : > { %v1219_v45 = vsel %vm519_vm5, 0.0, %v1218_v2  ;;  %v1222_v48 = vsel %vm519_vm5, %v1216_v1, %v1197_v63  ;;  %v1227_v47 = vrot.slane %v1217_v7, 4  ;;  %v1616_v7 = vld [vmem:[%s2255_s7] ss:$0 sm:$0xff] }
 0x4d2   : > { %v1215_v9 = vsel %vm519_vm5, 0.0, %v1214_v4  ;;  %v1226_v10 = vperm.slane %v1222_v48, %v1894_v44  ;;  %v1239_v11 = vsel %vm519_vm5, %v1238_v6, %v1219_v45  ;;  %v1258_v17 = vrot.slane %v1237_v5, 4 }
 0x4d3   : > { %v1243_v12 = vperm.slane %v1239_v11, %v1894_v44  ;;  %v1228_v13 = vsel %vm519_vm5, %v1227_v47, %v1215_v9  ;;  %v1423_v11 = vld [vmem:[%s2259_s11 + $0x70] sm:$0xff] }
 0x4d4   : > { %v1246_v14 = vrot.slane %v1226_v10, 4  ;;  %v1232_v15 = vperm.slane %v1228_v13, %v1894_v44  ;;  %v1420_v13 = vld [vmem:[%s2259_s11 + $0x58] sm:$0xff] }
 0x4d5   : > { %v1259_v16 = vsel %vm519_vm5, %v1243_v12, %v1258_v17  ;;  %v1256_v18 = vrot.slane %v1243_v12, 4  ;;  %v1422_v12 = vld [vmem:[%s2259_s11 + $0x68] sm:$0xff]  ;;  %v1421_v17 = vld [vmem:[%s2259_s11 + $0x60] sm:$0xff] }
 0x4d6   : > { %v1267_v35 = vperm.slane %v1259_v16, %v1901_v51  ;;  %v1247_v40 = vsel %vm519_vm5, %v1232_v15, %v1246_v14  ;;  %v1244_v36 = vrot.slane %v1232_v15, 4  ;;  %v1419_v14 = vld [vmem:[%s2259_s11 + $0x50] sm:$0xff]  ;;  %v1418_v15 = vld [vmem:[%s2259_s11 + $0x48] sm:$0xff]  ;;  %v1417_v16 = vld [vmem:[%s2259_s11 + $0x40] sm:$0xff] }
 0x4d7   : > { %v1257_v50 = vsel %vm519_vm5, %v1256_v18, %v1237_v5  ;;  %v1255_v21 = vperm.slane %v1247_v40, %v1901_v51  ;;  %v1416_v18 = vld [vmem:[%s2259_s11 + $0x38] sm:$0xff]  ;;  %v1414_v40 = vld [vmem:[%s2259_s11 + $0x28] sm:$0xff] }
 0x4d8   : > { %v1272_v22 = vrot.slane %v1267_v35, 4  ;;  %v1263_v23 = vperm.slane %v1257_v50, %v1901_v51  ;;  %v1245_v24 = vsel %vm519_vm5, %v1244_v36, %v1226_v10  ;;  %v1424_v10 = vld [vmem:[%s2259_s11 + $0x78] sm:$0xff]  ;;  %v1413_v36 = vld [vmem:[%s2259_s11 + $0x20] sm:$0xff] }
 0x4d9   : > { %v1251_v44 = vperm.slane %v1245_v24, %v1901_v51  ;;  %v1274_v29 = vrot.slane %v1255_v21, 4  ;;  %v1295_v51 = vld [vmem:[%s2253_s5 + $0x10] sm:$0xff]  ;;  %1429 = vmatpush.msra.mxu0 %v1424_v10  ;;  %v1412_v50 = vld [vmem:[%s2259_s11 + $0x18] sm:$0xff] }
 0x4da   : > { %v1273_v25 = vsel %vm519_vm5, %v1272_v22, %v1255_v21  ;;  %v1268_v26 = vrot.slane %v1263_v23, 4  ;;  %1317 = vmatpush.msrb.mxu2 %v1295_v51  ;;  %v1411_v21 = vld [vmem:[%s2259_s11 + $0x10] sm:$0xff]  ;;  %v1618_v22 = vld [vmem:[%s2258_s10] ss:$0 sm:$0xff] }
 0x4db   : > { %1281 = vrot.lane.b32.xlu0 %v1273_v25, %s1718_s20  ;;  %v1270_v19 = vrot.slane %v1251_v44, 4  ;;  %v1275_v30 = vsel %vm519_vm5, %v1267_v35, %v1274_v29  ;;  %1430 = vmatpush.msra.mxu0 %v1423_v11  ;;  %v1415_v35 = vld [vmem:[%s2259_s11 + $0x30] sm:$0xff]  ;;  %v1409_v25 = vld [vmem:[%s2259_s11] sm:$0xff] }
 0x4dc   : > { %v1269_v20 = vsel %vm519_vm5, %v1268_v26, %v1251_v44  ;;  %1318 = vmatpush.msrb.mxu2 %v1294_v32 }
 0x4dd   : > { %v1271_v28 = vsel %vm519_vm5, %v1263_v23, %v1270_v19  ;;  %vm1289_vm5 = vcmask 130048   ;;  %1431 = vmatpush.msra.mxu0 %v1422_v12  ;;  %v1410_v23 = vld [vmem:[%s2259_s11 + $0x8] sm:$0xff] }
 0x4de   : > { %1277 = vrot.lane.b32.xlu2 %v1271_v28, %s1719_s21  ;;  %1319 = vmatpush.msrb.mxu2 %v1293_v33 }
 0x4df   : > { %1432 = vmatpush.msra.mxu0 %v1421_v17 }
 0x4e1   : > { %1433 = vmatpush.msra.mxu0 %v1420_v13 }
 0x4e3   : > { %1434 = vmatpush.msra.mxu0 %v1419_v14 }
 0x4e5   : > { %1435 = vmatpush.msra.mxu0 %v1418_v15 }
 0x4e6   : > { %1285 = vrot.lane.b32.xlu2 %v1275_v30, %s1720_s22  ;;  %s429_s22 = sand.u32 1, %s1700_s26  }
 0x4e7   : > { %1436 = vmatpush.msra.mxu0 %v1417_v16  ;;  %s1530_s23 = sshll.u32 %s429_s22, 3  ;;  %s1452_s29 = scalar_lea.sflag [#allocation3], %s429_s22 }
 0x4e8   : > { %s431_s20 = scalar_lea.vmem [#allocation2], %s1530_s23  ;;  %s1666_s23 = scalar_lea.hbm %s2261_s13, 16 }
 0x4e9   : > { %1437 = vmatpush.msra.mxu0 %v1416_v18  ;;  %s1464_s21 = sshll.u32 %s431_s20, 4  ;;  %p1668_p1 = scmp.lt.s32.totalorder %s1666_s23, %s1662_s24  ;;  %s1465_s21 = int_to_ptr.vmem [resolvable:$true] %s1464_s21 }
 0x4eb   : > { %1438 = vmatpush.msra.mxu0 %v1415_v35  ;;  %p1669_p2 = por %p1668_p1, %p1667_p0 }
 0x4ed   : > { %1439 = vmatpush.msra.mxu0 %v1414_v40  ;;  %p1670_p3 = pnand %p1669_p2, %p1665_p13 }
 0x4ef   : > { %1440 = vmatpush.msra.mxu0 %v1413_v36 }
 0x4f1   : > { %1441 = vmatpush.msra.mxu0 %v1412_v50 }
 0x4f3   : > { %1442 = vmatpush.msra.mxu0 %v1411_v21 }
 0x4f5   : > { %1443 = vmatpush.msra.mxu0 %v1410_v23 }
 0x4f7   : > { %1444 = vmatpush.msra.mxu0 %v1409_v25 }
 0x538   : > { %v1278_v34 = vpop.permute.xlu2 %1277 }
 0x539   : > { %v1288_v37 = vsel %vm873_vm6, %v1269_v20, %v1278_v34 }
 0x540   : > { %v1286_v41 = vpop.permute.xlu2 %1285 }
 0x54d   : > { %v1282_v38 = vpop.permute.xlu0 %1281 }
 0x54e   : > { %v1290_v27 = vsel %vm1289_vm5, %v1288_v37, %v1282_v38 }
 0x54f   : > { %v1292_v42 = vsel %vm1291_vm10, %v1290_v27, %v1286_v41 }
 0x550   : > { %1545 = vmatmul.msk.f32.vlgmr.msrb.gmra.mxu2 %vm439_vm0, %v1292_v42  ;;  %v1619_v42 = vld [vmem:[%s2260_s12] ss:$0 sm:$0xff] }
 0x5d3   : > { %v1321_v46 = vpop.f32.mrf.mxu2 }
 0x5d4   : > { %v1322_v49 = vadd.f32 %v1615_v43, %v1321_v46 }
 0x5d6   : > { %v2133_v52 = vadd.f32 %v1322_v49, %v1844_v0  ;;  %v1359_v0 = vld [vmem:[%s2257_s9 + $0x10] sm:$0xff] }
 0x5d7   : > { %1381 = vmatpush.msra.mxu3 %v1359_v0 }
 0x5d8   : > { %v1327_v53 = vsel %vm439_vm0, %v2133_v52, 0.0 }
 0x5d9   : > { %1328 = vadd.xlane.f32.xlu2 %v1327_v53  ;;  %1382 = vmatpush.msra.mxu3 %v1358_v60 }
 0x5db   : > { %1383 = vmatpush.msra.mxu3 %v1357_v61 }
 0x64c   : > { %v1329_v54 = vpop.xlane.xlu2 %1328 }
 0x64d   : > { %v1330_v55 = vmul.f32 %v1329_v54, %v1848_v8 }
 0x64f   : > { %v1331_v56 = vsub.f32 %v2133_v52, %v1330_v55 }
 0x651   : > { %v1332_v57 = vmul.f32 %v1331_v56, %v1331_v56 }
 0x653   : > { %v1333_v58 = vsel %vm439_vm0, %v1332_v57, 0.0 }
 0x654   : > { %1334 = vadd.xlane.f32.xlu0 %v1333_v58 }
 0x6c7   : > { %v1335_v62 = vpop.xlane.xlu0 %1334 }
 0x6c8   : > { %v1336_v63 = vmul.f32 %v1335_v62, %v1848_v8  ;;  %v1617_v8 = vld [vmem:[%s2256_s8] ss:$0 sm:$0xff] }
 0x6ca   : > { %v1337_v1 = vadd.f32 1e-05, %v1336_v63 }
 0x6cc   : > { %1640 = vrsqrt.f32 %v1337_v1  ;;  %vm1344_vm11 = vweird.f32 %v1337_v1 }
 0x6d2   : > { %v1641_v2 = vpop.eup %1640 }
 0x6d3   : > { %v1339_v3 = vmul.f32 %v1641_v2, %v1337_v1  ;;  %vm1345_vm6 = vweird.f32 %v1641_v2 }
 0x6d4   : > { %vm1346_vm12 = vmor %vm1344_vm11, %vm1345_vm6 }
 0x6d5   : > { %v1340_v39 = vmul.f32 %v1641_v2, %v1339_v3 }
 0x6d7   : > { %v1341_v4 = vmul.f32 0.5, %v1340_v39 }
 0x6d9   : > { %v1342_v5 = vsub.f32 1.5, %v1341_v4 }
 0x6db   : > { %v1343_v6 = vmul.f32 %v1641_v2, %v1342_v5 }
 0x6dd   : > { %v1347_v45 = vsel %vm1346_vm12, %v1641_v2, %v1343_v6 }
 0x6de   : > { %v1348_v48 = vmul.f32 %v1347_v45, %v1331_v56 }
 0x6e0   : > { %v1352_v47 = vmul.f32 %v1616_v7, %v1348_v48 }
 0x6e2   : > { %v1356_v9 = vadd.f32 %v1617_v8, %v1352_v47 }
 0x6e4   : > { %1546 = vmatmul.msk.f32.vlgmr.msra.gmra.mxu3 %vm439_vm0, %v1356_v9 }
 0x767   : > { %v1385_v24 = vpop.f32.mrf.mxu3 }
 0x768   : > { %v1386_v44 = vadd.f32 %v1618_v22, %v1385_v24 }
 0x76a   : > { %v1547_v26 = vmul.f32 -1.702, %v1386_v44 }
 0x76c   : > { %v1390_v19 = vmul.f32 1.442695, %v1547_v26 }
 0x76e   : > { %1642 = vpow2.f32 %v1390_v19 }
 0x774   : > { %v1643_v20 = vpop.eup %1642 }
 0x775   : > { %v1392_v28 = vadd.f32 1.0, %v1643_v20 }
 0x777   : > { %1644 = vrcp.f32 %v1392_v28  ;;  %v1404_v51 = vand.u32 2147483648, %v1392_v28  ;;  %v1402_v33 = vand.u32 2147483647, %v1392_v28  ;;  %vm1398_vm14 = vweird.f32 %v1392_v28 }
 0x779   : > { %v1405_v37 = vor.u32 1.1754944e-38, %v1404_v51  ;;  %vm1403_vm1 = vcmp.eq.f32.partialorder %v1402_v33, 8.507059e+37 }
 0x77d   : > { %v1645_v29 = vpop.eup %1644 }
 0x77e   : > { %v1394_v30 = vmul.f32 %v1645_v29, %v1392_v28  ;;  %vm1399_vm13 = vweird.f32 %v1645_v29 }
 0x77f   : > { %vm1400_vm15 = vmor %vm1398_vm14, %vm1399_vm13 }
 0x780   : > { %v1395_v31 = vsub.f32 1.0, %v1394_v30 }
 0x782   : > { %v1396_v32 = vmul.f32 %v1645_v29, %v1395_v31 }
 0x784   : > { %v1397_v34 = vadd.f32 %v1645_v29, %v1396_v32 }
 0x786   : > { %v1401_v38 = vsel %vm1400_vm15, %v1645_v29, %v1397_v34 }
 0x787   : > { %v1406_v41 = vsel %vm1403_vm1, %v1405_v37, %v1401_v38 }
 0x788   : > { %v1408_v27 = vmul.f32 %v1406_v41, %v1386_v44 }
 0x78a   : > { %1445 = vmatmul.f32.vlgmr.msra.gmra.mxu0 %v1408_v27 }
 0x807   : > { %v1446_v43 = vpop.f32.mrf.mxu0 }
 0x808   : > { %v1447_v46 = vadd.f32 %v1619_v42, %v1446_v43 }
 0x80a   : > { %v1449_v49 = vadd.f32 %v1447_v46, %v2133_v52 }
 0x80c   : > { %1450 = vst.msk [vmem:[%s431_s20] sm:$0xff] %vm439_vm0, %v1449_v49 }
 0x80d   : > { %1673 = shalt.err (!%p1670_p3)
}
 0x80e   : > { %1552 = dma.vmem_to_hbm [thread:$0]  (%p1829_p5), %s1465_s21, 128, %s1467_s2, %s1452_s29  }
 0x80f PF: > { %p1558_p4 = scmp.ge.s32.totalorder %s1708_s28, 2  ;;  %s1478_s22 = sand.u32 1, %s1696_s25  }
 0x810   : > { %s1479_s16 = scalar_lea.sflag [#allocation3], %s1478_s22 }
 0x811   : > { %p1555_p7 = pnand %p1558_p4, %p1833_p6 }
 0x813   : > { %p1556_p8 = pneg %p1555_p7 }
 0x815   : > { %1691 = dma.done.wait (%p1556_p8), %s1479_s16, 128  }
 0x816   : > { %1693 = vsyncadd (%p1556_p8), %s1479_s16, 4294967168  ;;  %p23_p9 = scmp.ge.s32.totalorder %s1816_s14, 4   ;;  %s2272_s25 = smov %s1700_s26 }
 0x817   : > { %s2273_s26 = smov %s1704_s27  ;;  %s2274_s27 = smov %s1827_s17 }
 0x818   : > { %s2275_s28 = smov %s1816_s14  ;;  %25 = sbr.rel (!%p23_p9) target bundleno = 8 (0x8), region = 107 }
 0x81d   :  { %1485 = vsyncpa [#allocation3], 1 }
 0x81e   :  { %1487 = vsyncpa [#allocation3 + $0x1], 1 }

</bundles_post_ra>
